<compile_context>
chip_gen: v7x
topology: tpu7x:2x2x1
jax: 0.10.0
libtpu: 0.0.40
codegen_flags: <defaults>
</compile_context>

<pallas_src>
import functools

import jax
import jax.numpy as jnp
import numpy as np
from jax.experimental import pallas as pl
from jax.experimental.pallas import tpu as pltpu

D = 1024  # fixed by the PyTorch module: nn.Linear(d, 2) with d = 1024


def _fusion_kernel(x_ref, w_ref, b_ref, g_ref, *, do_pair):
    # x_ref: (TM, F) f32 streamed tile; w_ref: (F, C) f32 resident;
    # b_ref: (1, 1) f32 scalar in SMEM; g_ref: (TM, C) f32 output tile.
    logit = jnp.dot(x_ref[...], w_ref[...],
                    preferred_element_type=jnp.float32) + b_ref[0, 0]   # (TM, C)
    # first softmax over the 2 Linear outputs: component 1 == sigmoid(logit diff)
    g = pl.reciprocal(1.0 + jnp.exp(-logit), approx=True)               # EUP path
    if do_pair:
        # pair softmax over the two gates packed in each row:
        #   out[:, c] = sigmoid(g[:, c] - g[:, 1-c]) = 1/(1+exp((g0+g1) - 2*g_c))
        rs = jnp.sum(g, axis=-1, keepdims=True)                          # g0 + g1
        g = pl.reciprocal(1.0 + jnp.exp(rs - 2.0 * g), approx=True)      # (TM, 2)
    g_ref[...] = g


def _device_tiling():
    """Pick (max row tile, scoped-VMEM limit) per TPU generation.

    v7x-class (64 MiB VMEM/TC, ~3.2 TB/s HBM): bigger tile (TM=2048, f32 tile
    16 MiB/buffer, double-buffered) + 48 MiB limit so per-step overhead stays
    <~10% of step time.  v5e/v6e (128 MiB VMEM): TM=1024 / 32 MiB is already at
    the HBM roofline plateau.
    """
    try:
        vmem_cap = pltpu.get_tpu_info().vmem_capacity_bytes
    except Exception:
        vmem_cap = 128 * 1024 * 1024            # conservative fallback
    if vmem_cap <= 64 * 1024 * 1024:            # v7x-class part
        return 2048, 48 * 1024 * 1024
    return 1024, 32 * 1024 * 1024               # v5e / v6e


def fusion_node_forward(x, w, b, n_frames, *, tile_rows=None):
    """x: (B, N, D) f32; w: (2, D) f32; b: (2,) f32 -> (B, n_frames) f32."""
    B, N, d = x.shape
    assert d == D
    do_pair = N > 1

    w = jnp.asarray(w, jnp.float32)
    b = jnp.asarray(b, jnp.float32)
    wdiff = (w[1] - w[0]).reshape(D, 1)          # softmax(2) == sigmoid(diff)
    bdiff = (b[1] - b[0]).reshape(1, 1)          # scalar, lives in SMEM

    if do_pair:
        assert N % 2 == 0, "PyTorch view(B, -1, 2) requires an even token count"
        rows, feat, ncol = (B * N) // 2, 2 * D, 2
        x2 = x.reshape(rows, feat)               # free (contiguous), stays f32
        zero = jnp.zeros((D, 1), jnp.float32)
        wk = jnp.concatenate(
            [jnp.concatenate([wdiff, zero], axis=0),
             jnp.concatenate([zero, wdiff], axis=0)], axis=1)   # (2D, 2) f32
    else:
        rows, feat, ncol = B * N, D, 1
        x2 = x.reshape(rows, feat)
        wk = wdiff                                # (D, 1) f32

    if tile_rows is None:
        tm_max, vmem_limit = _device_tiling()
    else:                                         # test hook for ragged grids
        tm_max, vmem_limit = tile_rows, 32 * 1024 * 1024
    TM = rows if rows <= tm_max else tm_max
    grid = (pl.cdiv(rows, TM),)

    kernel = functools.partial(_fusion_kernel, do_pair=do_pair)
    g = pl.pallas_call(
        kernel,
        out_shape=jax.ShapeDtypeStruct((rows, ncol), jnp.float32),
        grid=grid,
        in_specs=[
            pl.BlockSpec((TM, feat), lambda i: (i, 0)),         # streamed f32 x tiles
            pl.BlockSpec((feat, ncol), lambda i: (0, 0)),       # resident weight
            pl.BlockSpec(memory_space=pltpu.MemorySpace.SMEM),  # scalar bias diff
        ],
        out_specs=pl.BlockSpec((TM, ncol), lambda i: (i, 0)),
        compiler_params=pltpu.CompilerParams(
            # "parallel" shards the row grid across v7x's two TensorCores
            # (no-op on single-TC v5e/v6e).
            dimension_semantics=("parallel",),
            vmem_limit_bytes=vmem_limit,
        ),
    )(x2, wk, bdiff)

    g = g.reshape(B, N)
    r = n_frames // N
    assert r * N == n_frames, "n_frames must be a multiple of the token count"
    # glue: g.view(B, N, 1).repeat(1, 1, r).view(B, n_frames)
    return jnp.repeat(g, r, axis=1)               # (B, n_frames)


def fusion_node_ref(x, w, b, n_frames):
    """Pure-JAX f32 reference mirroring the PyTorch forward."""
    eps = jnp.einsum("bnd,kd->bnk", x, w) + b
    g = jax.nn.softmax(eps, axis=-1)[..., 1]
    B, N = g.shape
    if N > 1:
        g = jax.nn.softmax(g.reshape(B, -1, 2), axis=-1).reshape(B, -1)
    r = n_frames // g.shape[1]
    return jnp.repeat(g, r, axis=1)


if __name__ == "__main__":
    key = jax.random.PRNGKey(0)
    kx, kw, kb = jax.random.split(key, 3)

    # deterministic synthetic Linear(d, 2) parameters
    w = jax.random.normal(kw, (2, D), dtype=jnp.float32) * (1.0 / np.sqrt(D))
    b = jax.random.normal(kb, (2,), dtype=jnp.float32) * 0.01

    TOL = 5e-3  # f32 streaming + f32 dot; only the EUP approx-recip differs

    # pair-softmax path (N > 1)
    B, N, n_frames = 2, 8, 16
    x = jax.random.normal(kx, (B, N, D), dtype=jnp.float32)
    out = jax.block_until_ready(fusion_node_forward(x, w, b, n_frames))
    ref = fusion_node_ref(x, w, b, n_frames)
    assert out.shape == (B, n_frames)
    np.testing.assert_allclose(np.asarray(out), np.asarray(ref), atol=TOL, rtol=TOL)

    # single-token path (N == 1, no pair softmax)
    B1, N1, nf1 = 3, 1, 4
    x1 = jax.random.normal(kx, (B1, N1, D), dtype=jnp.float32)
    out1 = jax.block_until_ready(fusion_node_forward(x1, w, b, nf1))
    ref1 = fusion_node_ref(x1, w, b, nf1)
    assert out1.shape == (B1, nf1)
    np.testing.assert_allclose(np.asarray(out1), np.asarray(ref1), atol=TOL, rtol=TOL)

    # ragged grid path: rows (= B*N/2 = 18) not a multiple of the forced row
    # tile (8) -> exercises the masked partial last block (per review).
    B2, N2, nf2 = 2, 18, 36
    x2 = jax.random.normal(kx, (B2, N2, D), dtype=jnp.float32)
    out2 = jax.block_until_ready(fusion_node_forward(x2, w, b, nf2, tile_rows=8))
    ref2 = fusion_node_ref(x2, w, b, nf2)
    assert out2.shape == (B2, nf2)
    np.testing.assert_allclose(np.asarray(out2), np.asarray(ref2), atol=TOL, rtol=TOL)

    print("KERNEL_OK")
</pallas_src>

<mosaic_0001>
module attributes {stable_mosaic.version = 11 : i64} {
  func.func @_fusion_kernel(%arg0: i32, %arg1: memref<8x2048xf32, #tpu.memory_space<vmem>>, %arg2: memref<2048x2xf32, #tpu.memory_space<vmem>>, %arg3: memref<1x1xf32, #tpu.memory_space<smem>>, %arg4: memref<8x2xf32, #tpu.memory_space<vmem>>) attributes {dimension_semantics = [#tpu.dimension_semantics<parallel>], iteration_bounds = array<i64: 1>, scalar_prefetch = 0 : i64, scratch_operands = 0 : i64, tpu.core_type = #tpu.core_type<tc>, window_params = [{transform_indices = @transform_0, window_bounds = array<i64: 8, 2048>}, {pipeline_mode = #tpu.pipeline_mode<synchronous>, transform_indices = @transform_1, window_bounds = array<i64: 2048, 2>}, {transform_indices = @transform_2, window_bounds = array<i64: 1, 1>}, {transform_indices = @transform_3, window_bounds = array<i64: 8, 2>}]} {
    %c0 = arith.constant 0 : index
    %c0_0 = arith.constant 0 : index
    %0 = vector.load %arg1[%c0, %c0_0] : memref<8x2048xf32, #tpu.memory_space<vmem>>, vector<8x2048xf32>
    %c0_1 = arith.constant 0 : index
    %c0_2 = arith.constant 0 : index
    %1 = vector.load %arg2[%c0_1, %c0_2] : memref<2048x2xf32, #tpu.memory_space<vmem>>, vector<2048x2xf32>
    %cst = arith.constant dense<0.000000e+00> : vector<8x2xf32>
    %2 = tpu.matmul %0, %1, %cst {dimension_numbers = #tpu.dot_dimension_numbers<[1], [0], [0], [1], [0, 0, 1, 1], [], []>} : vector<8x2048xf32>, vector<2048x2xf32>, vector<8x2xf32> -> vector<8x2xf32>
    %c0_3 = arith.constant 0 : index
    %c0_4 = arith.constant 0 : index
    %3 = memref.load %arg3[%c0_3, %c0_4] : memref<1x1xf32, #tpu.memory_space<smem>>
    %4 = vector.broadcast %3 : f32 to vector<8x2xf32>
    %5 = arith.addf %2, %4 : vector<8x2xf32>
    %cst_5 = arith.constant 0.000000e+00 : f32
    %6 = vector.broadcast %cst_5 : f32 to vector<8x2xf32>
    %7 = arith.subf %6, %5 : vector<8x2xf32>
    %8 = math.exp %7 : vector<8x2xf32>
    %cst_6 = arith.constant 1.000000e+00 : f32
    %9 = vector.broadcast %cst_6 : f32 to vector<8x2xf32>
    %10 = arith.addf %9, %8 : vector<8x2xf32>
    %11 = tpu.reciprocal %10 {approx = true} : vector<8x2xf32> -> vector<8x2xf32>
    %cst_7 = arith.constant dense<0.000000e+00> : vector<8xf32>
    %12 = vector.multi_reduction <add>, %11, %cst_7 [1] : vector<8x2xf32> to vector<8xf32>
    %13 = vector.shape_cast %12 : vector<8xf32> to vector<8x1xf32>
    %cst_8 = arith.constant 2.000000e+00 : f32
    %14 = vector.broadcast %cst_8 : f32 to vector<8x2xf32>
    %15 = arith.mulf %14, %11 : vector<8x2xf32>
    %16 = vector.broadcast %13 : vector<8x1xf32> to vector<8x2xf32>
    %17 = arith.subf %16, %15 : vector<8x2xf32>
    %18 = math.exp %17 : vector<8x2xf32>
    %cst_9 = arith.constant 1.000000e+00 : f32
    %19 = vector.broadcast %cst_9 : f32 to vector<8x2xf32>
    %20 = arith.addf %19, %18 : vector<8x2xf32>
    %21 = tpu.reciprocal %20 {approx = true} : vector<8x2xf32> -> vector<8x2xf32>
    %c0_10 = arith.constant 0 : index
    %c0_11 = arith.constant 0 : index
    %22 = vector.load %arg4[%c0_10, %c0_11] : memref<8x2xf32, #tpu.memory_space<vmem>>, vector<8x2xf32>
    tpu.vector_store %arg4[%c0_10, %c0_11], %21 {strides = array<i32>} : memref<8x2xf32, #tpu.memory_space<vmem>>, vector<8x2xf32>,
    return
  }
  func.func @transform_0(%arg0: i32) -> (i32, i32) {
    %c0_i32 = arith.constant 0 : i32
    %c0_i32_0 = arith.constant 0 : i32
    return %arg0, %c0_i32 : i32, i32
  }
  func.func @transform_1(%arg0: i32) -> (i32, i32) {
    %c0_i32 = arith.constant 0 : i32
    %c0_i32_0 = arith.constant 0 : i32
    %c0_i32_1 = arith.constant 0 : i32
    return %c0_i32, %c0_i32_0 : i32, i32
  }
  func.func @transform_2(%arg0: i32) -> (i32, i32) {
    %c0_i32 = arith.constant 0 : i32
    %c0_i32_0 = arith.constant 0 : i32
    %c0_i32_1 = arith.constant 0 : i32
    return %c0_i32, %c0_i32_0 : i32, i32
  }
  func.func @transform_3(%arg0: i32) -> (i32, i32) {
    %c0_i32 = arith.constant 0 : i32
    %c0_i32_0 = arith.constant 0 : i32
    return %arg0, %c0_i32 : i32, i32
  }
}

</mosaic_0001>

<bundles_post_ra>
// kernel: tpu_custom_call.1
= control target key start
LH: loop header
LB: loop body
LE: loop exit
PB: predicated region body
PF: predicated region fallthrough
CT: control target
= control target key end

     0   :  { %vm854_vm0 = vcmask 15360   ;;  %s2255_s1 = inlined_call_operand.vmem [shape: f32[2048,2], index: 1, kind: input, shape index: {}]   ;;  %s2256_s0 = inlined_call_operand.vmem [shape: f32[8,2048], index: 0, kind: input, shape index: {}]   ;;  %s2257_s2 = inlined_call_operand.<no memory space> [shape: f32[1,1], index: 2, kind: input, shape index: {}]   ;;  %s2258_s3 = inlined_call_operand.vmem [shape: f32[8,2], index: 3, kind: output, shape index: {}]  }
   0x1   :  { %v47_v0 = vld [vmem:[%s2255_s1 + $0x80] sm:$0xff]  ;;  %v48_v1 = vld [vmem:[%s2255_s1 + $0x88] sm:$0xff]  ;;  %v49_v11 = vld [vmem:[%s2255_s1 + $0x90] sm:$0xff] }
   0x2   :  { %v31_v2 = vld [vmem:[%s2255_s1] sm:$0xff]  ;;  %v1149_v3 = vpack.c.bf16 %v48_v1, %v47_v0  ;;  %v32_v4 = vld [vmem:[%s2255_s1 + $0x8] sm:$0xff]  ;;  %v50_v13 = vld [vmem:[%s2255_s1 + $0x98] sm:$0xff] }
   0x3   :  { %v79_v5 = vld [vmem:[%s2255_s1 + $0x180] sm:$0xff]  ;;  %v80_v6 = vld [vmem:[%s2255_s1 + $0x188] sm:$0xff]  ;;  %v1151_v7 = vpack.c.bf16 %v32_v4, %v31_v2  ;;  %v33_v14 = vld [vmem:[%s2255_s1 + $0x10] sm:$0xff]  ;;  %v1153_v16 = vpack.c.bf16 %v50_v13, %v49_v11 }
   0x4   :  { %v1181_v8 = vpack.c.bf16 %v80_v6, %v79_v5  ;;  %v63_v9 = vld [vmem:[%s2255_s1 + $0x100] sm:$0xff]  ;;  %v64_v10 = vld [vmem:[%s2255_s1 + $0x108] sm:$0xff]  ;;  %1150 = vmatprep.subr.bf16.mxu0 %v1149_v3  ;;  %v34_v15 = vld [vmem:[%s2255_s1 + $0x18] sm:$0xff] }
   0x5   :  { %v1183_v12 = vpack.c.bf16 %v64_v10, %v63_v9  ;;  %1152 = vmatpush3.bf16.msra.mxu0 %v1151_v7  ;;  %v1155_v17 = vpack.c.bf16 %v34_v15, %v33_v14  ;;  %v81_v18 = vld [vmem:[%s2255_s1 + $0x190] sm:$0xff]  ;;  %v82_v19 = vld [vmem:[%s2255_s1 + $0x198] sm:$0xff]  ;;  %v51_v23 = vld [vmem:[%s2255_s1 + $0xa0] sm:$0xff] }
   0x6   :  { %1182 = vmatprep.subr.bf16.mxu1 %v1181_v8  ;;  %v65_v20 = vld [vmem:[%s2255_s1 + $0x110] sm:$0xff]  ;;  %v1185_v21 = vpack.c.bf16 %v82_v19, %v81_v18  ;;  %v66_v22 = vld [vmem:[%s2255_s1 + $0x118] sm:$0xff]  ;;  %v52_v24 = vld [vmem:[%s2255_s1 + $0xa8] sm:$0xff]  ;;  %1154 = vmatprep.subr.bf16.mxu0 %v1153_v16 }
   0x7   :  { %1184 = vmatpush3.bf16.msra.mxu1 %v1183_v12  ;;  %v1187_v25 = vpack.c.bf16 %v66_v22, %v65_v20  ;;  %v1157_v26 = vpack.c.bf16 %v52_v24, %v51_v23  ;;  %v35_v27 = vld [vmem:[%s2255_s1 + $0x20] sm:$0xff]  ;;  %v36_v28 = vld [vmem:[%s2255_s1 + $0x28] sm:$0xff]  ;;  %v53_v35 = vld [vmem:[%s2255_s1 + $0xb0] sm:$0xff] }
   0x8   :  { %v83_v29 = vld [vmem:[%s2255_s1 + $0x1a0] sm:$0xff]  ;;  %1186 = vmatprep.subr.bf16.mxu1 %v1185_v21  ;;  %v84_v30 = vld [vmem:[%s2255_s1 + $0x1a8] sm:$0xff]  ;;  %v1159_v33 = vpack.c.bf16 %v36_v28, %v35_v27  ;;  %v54_v36 = vld [vmem:[%s2255_s1 + $0xb8] sm:$0xff] }
   0x9   :  { %v67_v31 = vld [vmem:[%s2255_s1 + $0x120] sm:$0xff]  ;;  %v68_v32 = vld [vmem:[%s2255_s1 + $0x128] sm:$0xff]  ;;  %1156 = vmatpush3.bf16.msra.mxu0 %v1155_v17  ;;  %v1189_v34 = vpack.c.bf16 %v84_v30, %v83_v29  ;;  %v37_v37 = vld [vmem:[%s2255_s1 + $0x30] sm:$0xff]  ;;  %v1161_v39 = vpack.c.bf16 %v54_v36, %v53_v35 }
   0xa   :  { %1158 = vmatprep.subr.bf16.mxu0 %v1157_v26  ;;  %v1191_v38 = vpack.c.bf16 %v68_v32, %v67_v31  ;;  %v38_v40 = vld [vmem:[%s2255_s1 + $0x38] sm:$0xff]  ;;  %v85_v41 = vld [vmem:[%s2255_s1 + $0x1b0] sm:$0xff]  ;;  %v55_v46 = vld [vmem:[%s2255_s1 + $0xc0] sm:$0xff] }
   0xb   :  { %1188 = vmatpush3.bf16.msra.mxu1 %v1187_v25  ;;  %v86_v42 = vld [vmem:[%s2255_s1 + $0x1b8] sm:$0xff]  ;;  %v69_v44 = vld [vmem:[%s2255_s1 + $0x130] sm:$0xff]  ;;  %v56_v47 = vld [vmem:[%s2255_s1 + $0xc8] sm:$0xff]  ;;  %v1163_v48 = vpack.c.bf16 %v38_v40, %v37_v37 }
   0xc   :  { %1190 = vmatprep.subr.bf16.mxu1 %v1189_v34  ;;  %v1193_v43 = vpack.c.bf16 %v86_v42, %v85_v41  ;;  %v70_v45 = vld [vmem:[%s2255_s1 + $0x138] sm:$0xff]  ;;  %v87_v49 = vld [vmem:[%s2255_s1 + $0x1c0] sm:$0xff]  ;;  %v88_v50 = vld [vmem:[%s2255_s1 + $0x1c8] sm:$0xff]  ;;  %v1165_v52 = vpack.c.bf16 %v56_v47, %v55_v46 }
   0xd   :  { %1160 = vmatpush3.bf16.msra.mxu0 %v1159_v33  ;;  %v1195_v51 = vpack.c.bf16 %v70_v45, %v69_v44  ;;  %v39_v53 = vld [vmem:[%s2255_s1 + $0x40] sm:$0xff]  ;;  %v40_v54 = vld [vmem:[%s2255_s1 + $0x48] sm:$0xff]  ;;  %v1197_v56 = vpack.c.bf16 %v88_v50, %v87_v49  ;;  %v57_v58 = vld [vmem:[%s2255_s1 + $0xd0] sm:$0xff] }
   0xe   :  { %1162 = vmatprep.subr.bf16.mxu0 %v1161_v39  ;;  %v71_v55 = vld [vmem:[%s2255_s1 + $0x140] sm:$0xff]  ;;  %v72_v57 = vld [vmem:[%s2255_s1 + $0x148] sm:$0xff]  ;;  %v58_v59 = vld [vmem:[%s2255_s1 + $0xd8] sm:$0xff]  ;;  %v1167_v62 = vpack.c.bf16 %v40_v54, %v39_v53 }
   0xf   :  { %1192 = vmatpush3.bf16.msra.mxu1 %v1191_v38  ;;  %v89_v60 = vld [vmem:[%s2255_s1 + $0x1d0] sm:$0xff]  ;;  %v90_v61 = vld [vmem:[%s2255_s1 + $0x1d8] sm:$0xff]  ;;  %v1199_v63 = vpack.c.bf16 %v72_v57, %v71_v55  ;;  %v1169_v0 = vpack.c.bf16 %v58_v59, %v57_v58  ;;  %v59_v6 = vld [vmem:[%s2255_s1 + $0xe0] sm:$0xff] }
  0x10   :  { %1194 = vmatprep.subr.bf16.mxu1 %v1193_v43  ;;  %v41_v1 = vld [vmem:[%s2255_s1 + $0x50] sm:$0xff]  ;;  %v42_v2 = vld [vmem:[%s2255_s1 + $0x58] sm:$0xff]  ;;  %v1201_v4 = vpack.c.bf16 %v90_v61, %v89_v60  ;;  %v60_v7 = vld [vmem:[%s2255_s1 + $0xe8] sm:$0xff] }
  0x11   :  { %1164 = vmatpush3.bf16.msra.mxu0 %v1163_v48  ;;  %v73_v3 = vld [vmem:[%s2255_s1 + $0x150] sm:$0xff]  ;;  %v74_v5 = vld [vmem:[%s2255_s1 + $0x158] sm:$0xff]  ;;  %v91_v8 = vld [vmem:[%s2255_s1 + $0x1e0] sm:$0xff]  ;;  %v1171_v10 = vpack.c.bf16 %v42_v2, %v41_v1  ;;  %v1173_v14 = vpack.c.bf16 %v60_v7, %v59_v6 }
  0x12   :  { %1166 = vmatprep.subr.bf16.mxu0 %v1165_v52  ;;  %v92_v9 = vld [vmem:[%s2255_s1 + $0x1e8] sm:$0xff]  ;;  %v43_v11 = vld [vmem:[%s2255_s1 + $0x60] sm:$0xff]  ;;  %v1203_v13 = vpack.c.bf16 %v74_v5, %v73_v3  ;;  %v61_v19 = vld [vmem:[%s2255_s1 + $0xf0] sm:$0xff] }
  0x13   :  { %1196 = vmatpush3.bf16.msra.mxu1 %v1195_v51  ;;  %v44_v12 = vld [vmem:[%s2255_s1 + $0x68] sm:$0xff]  ;;  %v75_v15 = vld [vmem:[%s2255_s1 + $0x160] sm:$0xff]  ;;  %v1205_v18 = vpack.c.bf16 %v92_v9, %v91_v8  ;;  %v62_v20 = vld [vmem:[%s2255_s1 + $0xf8] sm:$0xff] }
  0x14   :  { %1198 = vmatprep.subr.bf16.mxu1 %v1197_v56  ;;  %v76_v16 = vld [vmem:[%s2255_s1 + $0x168] sm:$0xff]  ;;  %v18_v21 = vld [vmem:[%s2256_s0 + $0x18] sm:$0xff]  ;;  %v93_v22 = vld [vmem:[%s2255_s1 + $0x1f0] sm:$0xff]  ;;  %v1175_v24 = vpack.c.bf16 %v44_v12, %v43_v11  ;;  %v1177_v26 = vpack.c.bf16 %v62_v20, %v61_v19 }
  0x15   :  { %1168 = vmatpush3.bf16.msra.mxu0 %v1167_v62  ;;  %v16_v17 = vld [vmem:[%s2256_s0 + $0x8] sm:$0xff]  ;;  %v94_v23 = vld [vmem:[%s2255_s1 + $0x1f8] sm:$0xff]  ;;  %423 = vmatprep.mubr.f32.mxu1 %v18_v21  ;;  %v1207_v25 = vpack.c.bf16 %v76_v16, %v75_v15  ;;  %v45_v27 = vld [vmem:[%s2255_s1 + $0x70] sm:$0xff] }
  0x16   :  { %1170 = vmatprep.subr.bf16.mxu0 %v1169_v0  ;;  %353 = vmatprep.mubr.f32.mxu0 %v16_v17  ;;  %v46_v28 = vld [vmem:[%s2255_s1 + $0x78] sm:$0xff]  ;;  %v77_v29 = vld [vmem:[%s2255_s1 + $0x170] sm:$0xff]  ;;  %v1209_v30 = vpack.c.bf16 %v94_v23, %v93_v22  ;;  %v111_v32 = vld [vmem:[%s2255_s1 + $0x280] sm:$0xff] }
  0x17   :  { %1200 = vmatpush3.bf16.msra.mxu1 %v1199_v63  ;;  %v78_v31 = vld [vmem:[%s2255_s1 + $0x178] sm:$0xff]  ;;  %v112_v33 = vld [vmem:[%s2255_s1 + $0x288] sm:$0xff]  ;;  %v143_v34 = vld [vmem:[%s2255_s1 + $0x380] sm:$0xff]  ;;  %v1179_v36 = vpack.c.bf16 %v46_v28, %v45_v27 }
  0x18   :  { %1202 = vmatprep.subr.bf16.mxu1 %v1201_v4  ;;  %v144_v35 = vld [vmem:[%s2255_s1 + $0x388] sm:$0xff]  ;;  %v1211_v37 = vpack.c.bf16 %v78_v31, %v77_v29  ;;  %v1213_v38 = vpack.c.bf16 %v112_v33, %v111_v32  ;;  %v95_v39 = vld [vmem:[%s2255_s1 + $0x200] sm:$0xff]  ;;  %v113_v44 = vld [vmem:[%s2255_s1 + $0x290] sm:$0xff] }
  0x19   :  { %1172 = vmatpush3.bf16.msra.mxu0 %v1171_v10  ;;  %v96_v40 = vld [vmem:[%s2255_s1 + $0x208] sm:$0xff]  ;;  %v127_v41 = vld [vmem:[%s2255_s1 + $0x300] sm:$0xff]  ;;  %v1245_v42 = vpack.c.bf16 %v144_v35, %v143_v34  ;;  %v114_v45 = vld [vmem:[%s2255_s1 + $0x298] sm:$0xff] }
  0x1a   :  { %1174 = vmatprep.subr.bf16.mxu0 %v1173_v14  ;;  %v128_v43 = vld [vmem:[%s2255_s1 + $0x308] sm:$0xff]  ;;  %v145_v46 = vld [vmem:[%s2255_s1 + $0x390] sm:$0xff]  ;;  %v146_v47 = vld [vmem:[%s2255_s1 + $0x398] sm:$0xff]  ;;  %v1215_v49 = vpack.c.bf16 %v96_v40, %v95_v39  ;;  %v1217_v52 = vpack.c.bf16 %v114_v45, %v113_v44 }
  0x1b   :  { %1204 = vmatpush3.bf16.msra.mxu1 %v1203_v13  ;;  %v15_v48 = vld [vmem:[%s2256_s0] sm:$0xff]  ;;  %v17_v50 = vld [vmem:[%s2256_s0 + $0x10] sm:$0xff]  ;;  %v1247_v51 = vpack.c.bf16 %v128_v43, %v127_v41  ;;  %v98_v54 = vld [vmem:[%s2255_s1 + $0x218] sm:$0xff]  ;;  %v1249_v56 = vpack.c.bf16 %v146_v47, %v145_v46 }
  0x1c   :  { %1206 = vmatprep.subr.bf16.mxu1 %v1205_v18  ;;  %v97_v53 = vld [vmem:[%s2255_s1 + $0x210] sm:$0xff]  ;;  %v130_v57 = vld [vmem:[%s2255_s1 + $0x318] sm:$0xff]  ;;  %v115_v58 = vld [vmem:[%s2255_s1 + $0x2a0] sm:$0xff] }
  0x1d   :  { %1176 = vmatpush3.bf16.msra.mxu0 %v1175_v24  ;;  %v129_v55 = vld [vmem:[%s2255_s1 + $0x310] sm:$0xff]  ;;  %v116_v59 = vld [vmem:[%s2255_s1 + $0x2a8] sm:$0xff]  ;;  %v147_v60 = vld [vmem:[%s2255_s1 + $0x3a0] sm:$0xff]  ;;  %v1219_v62 = vpack.c.bf16 %v98_v54, %v97_v53 }
  0x1e   :  { %1178 = vmatprep.subr.bf16.mxu0 %v1177_v26  ;;  %v148_v61 = vld [vmem:[%s2255_s1 + $0x3a8] sm:$0xff]  ;;  %v1251_v63 = vpack.c.bf16 %v130_v57, %v129_v55  ;;  %v1221_v0 = vpack.c.bf16 %v116_v59, %v115_v58  ;;  %v99_v1 = vld [vmem:[%s2255_s1 + $0x220] sm:$0xff]  ;;  %v117_v6 = vld [vmem:[%s2255_s1 + $0x2b0] sm:$0xff] }
  0x1f   :  { %1208 = vmatpush3.bf16.msra.mxu1 %v1207_v25  ;;  %v100_v2 = vld [vmem:[%s2255_s1 + $0x228] sm:$0xff]  ;;  %v131_v3 = vld [vmem:[%s2255_s1 + $0x320] sm:$0xff]  ;;  %v1253_v4 = vpack.c.bf16 %v148_v61, %v147_v60  ;;  %v118_v7 = vld [vmem:[%s2255_s1 + $0x2b8] sm:$0xff] }
  0x20   :  { %1210 = vmatprep.subr.bf16.mxu1 %v1209_v30  ;;  %v132_v5 = vld [vmem:[%s2255_s1 + $0x328] sm:$0xff]  ;;  %v149_v8 = vld [vmem:[%s2255_s1 + $0x3b0] sm:$0xff]  ;;  %v150_v9 = vld [vmem:[%s2255_s1 + $0x3b8] sm:$0xff]  ;;  %v1223_v10 = vpack.c.bf16 %v100_v2, %v99_v1  ;;  %v1225_v12 = vpack.c.bf16 %v118_v7, %v117_v6 }
  0x21   :  { %1180 = vmatpush3.bf16.msra.mxu0 %v1179_v36  ;;  %v1255_v11 = vpack.c.bf16 %v132_v5, %v131_v3  ;;  %v101_v13 = vld [vmem:[%s2255_s1 + $0x230] sm:$0xff]  ;;  %v102_v14 = vld [vmem:[%s2255_s1 + $0x238] sm:$0xff]  ;;  %v1257_v16 = vpack.c.bf16 %v150_v9, %v149_v8  ;;  %v119_v18 = vld [vmem:[%s2255_s1 + $0x2c0] sm:$0xff] }
  0x22   :  { %1214 = vmatprep.subr.bf16.mxu0 %v1213_v38  ;;  %v133_v15 = vld [vmem:[%s2255_s1 + $0x330] sm:$0xff]  ;;  %v134_v17 = vld [vmem:[%s2255_s1 + $0x338] sm:$0xff]  ;;  %v120_v19 = vld [vmem:[%s2255_s1 + $0x2c8] sm:$0xff]  ;;  %v1227_v22 = vpack.c.bf16 %v102_v14, %v101_v13 }
  0x23   :  { %1212 = vmatpush3.bf16.msra.mxu1 %v1211_v37  ;;  %v151_v20 = vld [vmem:[%s2255_s1 + $0x3c0] sm:$0xff]  ;;  %v152_v21 = vld [vmem:[%s2255_s1 + $0x3c8] sm:$0xff]  ;;  %v1259_v25 = vpack.c.bf16 %v134_v17, %v133_v15  ;;  %v1229_v26 = vpack.c.bf16 %v120_v19, %v119_v18  ;;  %v22_v29 = vld [vmem:[%s2256_s0 + $0x38] sm:$0xff] }
  0x24   :  { %1246 = vmatprep.subr.bf16.mxu1 %v1245_v42  ;;  %354 = vmatmul.mubr.f32.vlgmr.msra.gmra.mrb[0].mxu0 %v15_v48  ;;  %v103_v23 = vld [vmem:[%s2255_s1 + $0x240] sm:$0xff]  ;;  %v20_v24 = vld [vmem:[%s2256_s0 + $0x28] sm:$0xff]  ;;  %v1261_v30 = vpack.c.bf16 %v152_v21, %v151_v20  ;;  %v121_v32 = vld [vmem:[%s2255_s1 + $0x2d0] sm:$0xff] }
  0x25   :  { %1216 = vmatpush3.bf16.msra.mxu0 %v1215_v49  ;;  %v104_v27 = vld [vmem:[%s2255_s1 + $0x248] sm:$0xff]  ;;  %v135_v28 = vld [vmem:[%s2255_s1 + $0x340] sm:$0xff]  ;;  %v122_v33 = vld [vmem:[%s2255_s1 + $0x2d8] sm:$0xff]  ;;  %493 = vmatprep.mubr.f32.mxu0 %v20_v24 }
  0x26   :  { %424 = vmatmul.mubr.f32.vlgmr.msra.gmra.mrb[0].mxu1 %v17_v50  ;;  %1218 = vmatprep.subr.bf16.mxu0 %v1217_v52  ;;  %v136_v31 = vld [vmem:[%s2255_s1 + $0x348] sm:$0xff]  ;;  %v153_v34 = vld [vmem:[%s2255_s1 + $0x3d0] sm:$0xff]  ;;  %v154_v35 = vld [vmem:[%s2255_s1 + $0x3d8] sm:$0xff]  ;;  %v1231_v36 = vpack.c.bf16 %v104_v27, %v103_v23  ;;  %v1233_v38 = vpack.c.bf16 %v122_v33, %v121_v32 }
  0x27   :  { %1248 = vmatpush3.bf16.msra.mxu1 %v1247_v51  ;;  %563 = vmatprep.mubr.f32.mxu1 %v22_v29  ;;  %v1263_v37 = vpack.c.bf16 %v136_v31, %v135_v28  ;;  %v105_v39 = vld [vmem:[%s2255_s1 + $0x250] sm:$0xff]  ;;  %v106_v40 = vld [vmem:[%s2255_s1 + $0x258] sm:$0xff]  ;;  %v1265_v42 = vpack.c.bf16 %v154_v35, %v153_v34  ;;  %v123_v44 = vld [vmem:[%s2255_s1 + $0x2e0] sm:$0xff] }
  0x28   :  { %1250 = vmatprep.subr.bf16.mxu1 %v1249_v56  ;;  %v137_v41 = vld [vmem:[%s2255_s1 + $0x350] sm:$0xff]  ;;  %v138_v43 = vld [vmem:[%s2255_s1 + $0x358] sm:$0xff]  ;;  %v124_v45 = vld [vmem:[%s2255_s1 + $0x2e8] sm:$0xff]  ;;  %v1235_v48 = vpack.c.bf16 %v106_v40, %v105_v39 }
  0x29   :  { %1220 = vmatpush3.bf16.msra.mxu0 %v1219_v62  ;;  %v155_v46 = vld [vmem:[%s2255_s1 + $0x3e0] sm:$0xff]  ;;  %v156_v47 = vld [vmem:[%s2255_s1 + $0x3e8] sm:$0xff]  ;;  %v1267_v49 = vpack.c.bf16 %v138_v43, %v137_v41  ;;  %v1237_v50 = vpack.c.bf16 %v124_v45, %v123_v44  ;;  %v125_v56 = vld [vmem:[%s2255_s1 + $0x2f0] sm:$0xff] }
  0x2a   :  { %1222 = vmatprep.subr.bf16.mxu0 %v1221_v0  ;;  %v107_v51 = vld [vmem:[%s2255_s1 + $0x260] sm:$0xff]  ;;  %v108_v52 = vld [vmem:[%s2255_s1 + $0x268] sm:$0xff]  ;;  %v1269_v54 = vpack.c.bf16 %v156_v47, %v155_v46  ;;  %v126_v57 = vld [vmem:[%s2255_s1 + $0x2f8] sm:$0xff] }
  0x2b   :  { %1252 = vmatpush3.bf16.msra.mxu1 %v1251_v63  ;;  %v139_v53 = vld [vmem:[%s2255_s1 + $0x360] sm:$0xff]  ;;  %v140_v55 = vld [vmem:[%s2255_s1 + $0x368] sm:$0xff]  ;;  %v157_v58 = vld [vmem:[%s2255_s1 + $0x3f0] sm:$0xff]  ;;  %v1239_v60 = vpack.c.bf16 %v108_v52, %v107_v51  ;;  %v1241_v62 = vpack.c.bf16 %v126_v57, %v125_v56 }
  0x2c   :  { %1254 = vmatprep.subr.bf16.mxu1 %v1253_v4  ;;  %v158_v59 = vld [vmem:[%s2255_s1 + $0x3f8] sm:$0xff]  ;;  %v1271_v61 = vpack.c.bf16 %v140_v55, %v139_v53  ;;  %v109_v63 = vld [vmem:[%s2255_s1 + $0x270] sm:$0xff]  ;;  %v175_v4 = vld [vmem:[%s2255_s1 + $0x480] sm:$0xff] }
  0x2d   :  { %1224 = vmatpush3.bf16.msra.mxu0 %v1223_v10  ;;  %v110_v0 = vld [vmem:[%s2255_s1 + $0x278] sm:$0xff]  ;;  %v141_v1 = vld [vmem:[%s2255_s1 + $0x370] sm:$0xff]  ;;  %v1273_v2 = vpack.c.bf16 %v158_v59, %v157_v58  ;;  %v176_v5 = vld [vmem:[%s2255_s1 + $0x488] sm:$0xff] }
  0x2e   :  { %1226 = vmatprep.subr.bf16.mxu0 %v1225_v12  ;;  %v142_v3 = vld [vmem:[%s2255_s1 + $0x378] sm:$0xff]  ;;  %v207_v6 = vld [vmem:[%s2255_s1 + $0x580] sm:$0xff]  ;;  %v208_v7 = vld [vmem:[%s2255_s1 + $0x588] sm:$0xff]  ;;  %v1243_v8 = vpack.c.bf16 %v110_v0, %v109_v63  ;;  %v1277_v10 = vpack.c.bf16 %v176_v5, %v175_v4 }
  0x2f   :  { %1256 = vmatpush3.bf16.msra.mxu1 %v1255_v11  ;;  %v1275_v9 = vpack.c.bf16 %v142_v3, %v141_v1  ;;  %v159_v11 = vld [vmem:[%s2255_s1 + $0x400] sm:$0xff]  ;;  %v160_v12 = vld [vmem:[%s2255_s1 + $0x408] sm:$0xff]  ;;  %v1309_v14 = vpack.c.bf16 %v208_v7, %v207_v6  ;;  %v178_v17 = vld [vmem:[%s2255_s1 + $0x498] sm:$0xff] }
  0x30   :  { %1258 = vmatprep.subr.bf16.mxu1 %v1257_v16  ;;  %v191_v13 = vld [vmem:[%s2255_s1 + $0x500] sm:$0xff]  ;;  %v192_v15 = vld [vmem:[%s2255_s1 + $0x508] sm:$0xff]  ;;  %v177_v16 = vld [vmem:[%s2255_s1 + $0x490] sm:$0xff]  ;;  %v1279_v21 = vpack.c.bf16 %v160_v12, %v159_v11 }
  0x31   :  { %1228 = vmatpush3.bf16.msra.mxu0 %v1227_v22  ;;  %v209_v18 = vld [vmem:[%s2255_s1 + $0x590] sm:$0xff]  ;;  %v210_v19 = vld [vmem:[%s2255_s1 + $0x598] sm:$0xff]  ;;  %v19_v20 = vld [vmem:[%s2256_s0 + $0x20] sm:$0xff]  ;;  %v1311_v23 = vpack.c.bf16 %v192_v15, %v191_v13  ;;  %v1281_v24 = vpack.c.bf16 %v178_v17, %v177_v16 }
  0x32   :  { %1230 = vmatprep.subr.bf16.mxu0 %v1229_v26  ;;  %v21_v22 = vld [vmem:[%s2256_s0 + $0x30] sm:$0xff]  ;;  %v162_v26 = vld [vmem:[%s2255_s1 + $0x418] sm:$0xff]  ;;  %v1313_v28 = vpack.c.bf16 %v210_v19, %v209_v18  ;;  %v180_v31 = vld [vmem:[%s2255_s1 + $0x4a8] sm:$0xff] }
  0x33   :  { %1260 = vmatpush3.bf16.msra.mxu1 %v1259_v25  ;;  %v161_v25 = vld [vmem:[%s2255_s1 + $0x410] sm:$0xff]  ;;  %v194_v29 = vld [vmem:[%s2255_s1 + $0x518] sm:$0xff]  ;;  %v211_v32 = vld [vmem:[%s2255_s1 + $0x5a0] sm:$0xff] }
  0x34   :  { %1262 = vmatprep.subr.bf16.mxu1 %v1261_v30  ;;  %v193_v27 = vld [vmem:[%s2255_s1 + $0x510] sm:$0xff]  ;;  %v179_v30 = vld [vmem:[%s2255_s1 + $0x4a0] sm:$0xff]  ;;  %v212_v33 = vld [vmem:[%s2255_s1 + $0x5a8] sm:$0xff]  ;;  %v1283_v35 = vpack.c.bf16 %v162_v26, %v161_v25 }
  0x35   :  { %1232 = vmatpush3.bf16.msra.mxu0 %v1231_v36  ;;  %v24_v34 = vld [vmem:[%s2256_s0 + $0x48] sm:$0xff]  ;;  %v26_v36 = vld [vmem:[%s2256_s0 + $0x58] sm:$0xff]  ;;  %v163_v39 = vld [vmem:[%s2255_s1 + $0x420] sm:$0xff] }
  0x36   :  { %1234 = vmatprep.subr.bf16.mxu0 %v1233_v38  ;;  %v1285_v38 = vpack.c.bf16 %v180_v31, %v179_v30  ;;  %v164_v40 = vld [vmem:[%s2255_s1 + $0x428] sm:$0xff]  ;;  %v195_v41 = vld [vmem:[%s2255_s1 + $0x520] sm:$0xff]  ;;  %v181_v44 = vld [vmem:[%s2255_s1 + $0x4b0] sm:$0xff] }
  0x37   :  { %1264 = vmatpush3.bf16.msra.mxu1 %v1263_v37  ;;  %v1315_v37 = vpack.c.bf16 %v194_v29, %v193_v27  ;;  %v196_v43 = vld [vmem:[%s2255_s1 + $0x528] sm:$0xff]  ;;  %v182_v45 = vld [vmem:[%s2255_s1 + $0x4b8] sm:$0xff]  ;;  %v213_v46 = vld [vmem:[%s2255_s1 + $0x5b0] sm:$0xff] }
  0x38   :  { %1266 = vmatprep.subr.bf16.mxu1 %v1265_v42  ;;  %v1317_v42 = vpack.c.bf16 %v212_v33, %v211_v32  ;;  %v214_v47 = vld [vmem:[%s2255_s1 + $0x5b8] sm:$0xff]  ;;  %v165_v51 = vld [vmem:[%s2255_s1 + $0x430] sm:$0xff]  ;;  %v183_v56 = vld [vmem:[%s2255_s1 + $0x4c0] sm:$0xff] }
  0x39   :  { %1236 = vmatpush3.bf16.msra.mxu0 %v1235_v48  ;;  %v1287_v48 = vpack.c.bf16 %v164_v40, %v163_v39  ;;  %v166_v52 = vld [vmem:[%s2255_s1 + $0x438] sm:$0xff]  ;;  %v197_v53 = vld [vmem:[%s2255_s1 + $0x530] sm:$0xff]  ;;  %v184_v57 = vld [vmem:[%s2255_s1 + $0x4c8] sm:$0xff] }
  0x3a   :  { %1238 = vmatprep.subr.bf16.mxu0 %v1237_v50  ;;  %v1289_v50 = vpack.c.bf16 %v182_v45, %v181_v44  ;;  %v198_v55 = vld [vmem:[%s2255_s1 + $0x538] sm:$0xff]  ;;  %v215_v58 = vld [vmem:[%s2255_s1 + $0x5c0] sm:$0xff]  ;;  %v216_v59 = vld [vmem:[%s2255_s1 + $0x5c8] sm:$0xff] }
  0x3b   :  { %1268 = vmatpush3.bf16.msra.mxu1 %v1267_v49  ;;  %v1319_v49 = vpack.c.bf16 %v196_v43, %v195_v41  ;;  %v167_v63 = vld [vmem:[%s2255_s1 + $0x440] sm:$0xff]  ;;  %v168_v0 = vld [vmem:[%s2255_s1 + $0x448] sm:$0xff]  ;;  %v185_v4 = vld [vmem:[%s2255_s1 + $0x4d0] sm:$0xff] }
  0x3c   :  { %1270 = vmatprep.subr.bf16.mxu1 %v1269_v54  ;;  %v1321_v54 = vpack.c.bf16 %v214_v47, %v213_v46  ;;  %v199_v1 = vld [vmem:[%s2255_s1 + $0x540] sm:$0xff]  ;;  %v200_v3 = vld [vmem:[%s2255_s1 + $0x548] sm:$0xff]  ;;  %v186_v5 = vld [vmem:[%s2255_s1 + $0x4d8] sm:$0xff] }
  0x3d   :  { %1240 = vmatpush3.bf16.msra.mxu0 %v1239_v60  ;;  %v1291_v60 = vpack.c.bf16 %v166_v52, %v165_v51  ;;  %v217_v6 = vld [vmem:[%s2255_s1 + $0x5d0] sm:$0xff]  ;;  %v218_v7 = vld [vmem:[%s2255_s1 + $0x5d8] sm:$0xff]  ;;  %v187_v16 = vld [vmem:[%s2255_s1 + $0x4e0] sm:$0xff] }
  0x3e   :  { %1242 = vmatprep.subr.bf16.mxu0 %v1241_v62  ;;  %v1293_v62 = vpack.c.bf16 %v184_v57, %v183_v56  ;;  %v169_v11 = vld [vmem:[%s2255_s1 + $0x450] sm:$0xff]  ;;  %v170_v12 = vld [vmem:[%s2255_s1 + $0x458] sm:$0xff]  ;;  %v188_v17 = vld [vmem:[%s2255_s1 + $0x4e8] sm:$0xff] }
  0x3f   :  { %1272 = vmatpush3.bf16.msra.mxu1 %v1271_v61  ;;  %v1323_v61 = vpack.c.bf16 %v198_v55, %v197_v53  ;;  %v201_v13 = vld [vmem:[%s2255_s1 + $0x550] sm:$0xff]  ;;  %v202_v15 = vld [vmem:[%s2255_s1 + $0x558] sm:$0xff]  ;;  %v219_v18 = vld [vmem:[%s2255_s1 + $0x5e0] sm:$0xff] }
  0x40   :  { %1274 = vmatprep.subr.bf16.mxu1 %v1273_v2  ;;  %v1325_v2 = vpack.c.bf16 %v216_v59, %v215_v58  ;;  %v220_v19 = vld [vmem:[%s2255_s1 + $0x5e8] sm:$0xff]  ;;  %v203_v25 = vld [vmem:[%s2255_s1 + $0x560] sm:$0xff]  ;;  %v190_v29 = vld [vmem:[%s2255_s1 + $0x4f8] sm:$0xff] }
  0x41   :  { %1244 = vmatpush3.bf16.msra.mxu0 %v1243_v8  ;;  %v1295_v8 = vpack.c.bf16 %v168_v0, %v167_v63  ;;  %v1333_v26 = vpack.c.bf16 %v220_v19, %v219_v18  ;;  %v204_v27 = vld [vmem:[%s2255_s1 + $0x568] sm:$0xff]  ;;  %v221_v30 = vld [vmem:[%s2255_s1 + $0x5f0] sm:$0xff]  ;;  %v222_v31 = vld [vmem:[%s2255_s1 + $0x5f8] sm:$0xff] }
  0x42   :  { %1278 = vmatprep.subr.bf16.mxu0 %v1277_v10  ;;  %v1297_v10 = vpack.c.bf16 %v186_v5, %v185_v4  ;;  %v1335_v33 = vpack.c.bf16 %v204_v27, %v203_v25  ;;  %v206_v39 = vld [vmem:[%s2255_s1 + $0x578] sm:$0xff]  ;;  %v239_v40 = vld [vmem:[%s2255_s1 + $0x680] sm:$0xff]  ;;  %v240_v41 = vld [vmem:[%s2255_s1 + $0x688] sm:$0xff] }
  0x43   :  { %1276 = vmatpush3.bf16.msra.mxu1 %v1275_v9  ;;  %v1327_v9 = vpack.c.bf16 %v200_v3, %v199_v1  ;;  %v272_v43 = vld [vmem:[%s2255_s1 + $0x788] sm:$0xff]  ;;  %v1341_v46 = vpack.c.bf16 %v240_v41, %v239_v40  ;;  %v223_v47 = vld [vmem:[%s2255_s1 + $0x600] sm:$0xff]  ;;  %v241_v52 = vld [vmem:[%s2255_s1 + $0x690] sm:$0xff] }
  0x44   :  { %1310 = vmatprep.subr.bf16.mxu1 %v1309_v14  ;;  %494 = vmatmul.mubr.f32.vlgmr.msra.gmra.mrb[2].mxu0 %v19_v20  ;;  %v1329_v14 = vpack.c.bf16 %v218_v7, %v217_v6  ;;  %v1299_v20 = vpack.c.bf16 %v170_v12, %v169_v11  ;;  %v256_v51 = vld [vmem:[%s2255_s1 + $0x708] sm:$0xff]  ;;  %v242_v53 = vld [vmem:[%s2255_s1 + $0x698] sm:$0xff]  ;;  %v23_v56 = vld [vmem:[%s2256_s0 + $0x40] sm:$0xff] }
  0x45   :  { %1280 = vmatpush3.bf16.msra.mxu0 %v1279_v21  ;;  %633 = vmatprep.mubr.f32.mxu0 %v24_v34  ;;  %v1331_v21 = vpack.c.bf16 %v202_v15, %v201_v13  ;;  %v274_v55 = vld [vmem:[%s2255_s1 + $0x798] sm:$0xff]  ;;  %v25_v58 = vld [vmem:[%s2256_s0 + $0x50] sm:$0xff]  ;;  %v244_v3 = vld [vmem:[%s2255_s1 + $0x6a8] sm:$0xff] }
  0x46   :  { %564 = vmatmul.mubr.f32.vlgmr.msra.gmra.mrb[2].mxu1 %v21_v22  ;;  %1282 = vmatprep.subr.bf16.mxu0 %v1281_v24  ;;  %v1301_v22 = vpack.c.bf16 %v188_v17, %v187_v16  ;;  %v172_v24 = vld [vmem:[%s2255_s1 + $0x468] sm:$0xff]  ;;  %v257_v63 = vld [vmem:[%s2255_s1 + $0x710] sm:$0xff]  ;;  %v258_v1 = vld [vmem:[%s2255_s1 + $0x718] sm:$0xff] }
  0x47   :  { %1312 = vmatpush3.bf16.msra.mxu1 %v1311_v23  ;;  %703 = vmatprep.mubr.f32.mxu1 %v26_v36  ;;  %v171_v23 = vld [vmem:[%s2255_s1 + $0x460] sm:$0xff]  ;;  %v174_v36 = vld [vmem:[%s2255_s1 + $0x478] sm:$0xff]  ;;  %v276_v5 = vld [vmem:[%s2255_s1 + $0x7a8] sm:$0xff] }
  0x48   :  { %1314 = vmatprep.subr.bf16.mxu1 %v1313_v28  ;;  %v189_v28 = vld [vmem:[%s2255_s1 + $0x4f0] sm:$0xff]  ;;  %v1303_v32 = vpack.c.bf16 %v172_v24, %v171_v23  ;;  %v275_v4 = vld [vmem:[%s2255_s1 + $0x7a0] sm:$0xff]  ;;  %v28_v6 = vld [vmem:[%s2256_s0 + $0x68] sm:$0xff] }
  0x49   :  { %1284 = vmatpush3.bf16.msra.mxu0 %v1283_v35  ;;  %v1305_v34 = vpack.c.bf16 %v190_v29, %v189_v28  ;;  %v173_v35 = vld [vmem:[%s2255_s1 + $0x470] sm:$0xff]  ;;  %v227_v11 = vld [vmem:[%s2255_s1 + $0x620] sm:$0xff]  ;;  %v228_v12 = vld [vmem:[%s2255_s1 + $0x628] sm:$0xff] }
  0x4a   :  { %1286 = vmatprep.subr.bf16.mxu0 %v1285_v38  ;;  %v1337_v38 = vpack.c.bf16 %v222_v31, %v221_v30  ;;  %v1307_v44 = vpack.c.bf16 %v174_v36, %v173_v35  ;;  %v259_v13 = vld [vmem:[%s2255_s1 + $0x720] sm:$0xff]  ;;  %v260_v15 = vld [vmem:[%s2255_s1 + $0x728] sm:$0xff]  ;;  %v245_v16 = vld [vmem:[%s2255_s1 + $0x6b0] sm:$0xff] }
  0x4b   :  { %1316 = vmatpush3.bf16.msra.mxu1 %v1315_v37  ;;  %v205_v37 = vld [vmem:[%s2255_s1 + $0x570] sm:$0xff]  ;;  %v246_v17 = vld [vmem:[%s2255_s1 + $0x6b8] sm:$0xff]  ;;  %v247_v28 = vld [vmem:[%s2255_s1 + $0x6c0] sm:$0xff] }
  0x4c   :  { %1318 = vmatprep.subr.bf16.mxu1 %v1317_v42  ;;  %v271_v42 = vld [vmem:[%s2255_s1 + $0x780] sm:$0xff]  ;;  %v1339_v45 = vpack.c.bf16 %v206_v39, %v205_v37  ;;  %v277_v18 = vld [vmem:[%s2255_s1 + $0x7b0] sm:$0xff]  ;;  %v278_v19 = vld [vmem:[%s2255_s1 + $0x7b8] sm:$0xff] }
  0x4d   :  { %1288 = vmatpush3.bf16.msra.mxu0 %v1287_v48  ;;  %v224_v48 = vld [vmem:[%s2255_s1 + $0x608] sm:$0xff]  ;;  %v229_v23 = vld [vmem:[%s2255_s1 + $0x630] sm:$0xff]  ;;  %v230_v24 = vld [vmem:[%s2255_s1 + $0x638] sm:$0xff] }
  0x4e   :  { %1290 = vmatprep.subr.bf16.mxu0 %v1289_v50  ;;  %v1373_v50 = vpack.c.bf16 %v272_v43, %v271_v42  ;;  %v1343_v57 = vpack.c.bf16 %v224_v48, %v223_v47  ;;  %v261_v25 = vld [vmem:[%s2255_s1 + $0x730] sm:$0xff]  ;;  %v262_v27 = vld [vmem:[%s2255_s1 + $0x738] sm:$0xff]  ;;  %v248_v29 = vld [vmem:[%s2255_s1 + $0x6c8] sm:$0xff] }
  0x4f   :  { %1320 = vmatpush3.bf16.msra.mxu1 %v1319_v49  ;;  %v255_v49 = vld [vmem:[%s2255_s1 + $0x700] sm:$0xff]  ;;  %v280_v31 = vld [vmem:[%s2255_s1 + $0x7c8] sm:$0xff]  ;;  %v249_v40 = vld [vmem:[%s2255_s1 + $0x6d0] sm:$0xff] }
  0x50   :  { %1322 = vmatprep.subr.bf16.mxu1 %v1321_v54  ;;  %v273_v54 = vld [vmem:[%s2255_s1 + $0x790] sm:$0xff]  ;;  %v1375_v59 = vpack.c.bf16 %v256_v51, %v255_v49  ;;  %v279_v30 = vld [vmem:[%s2255_s1 + $0x7c0] sm:$0xff]  ;;  %v232_v36 = vld [vmem:[%s2255_s1 + $0x648] sm:$0xff] }
  0x51   :  { %1292 = vmatpush3.bf16.msra.mxu0 %v1291_v60  ;;  %v1345_v60 = vpack.c.bf16 %v242_v53, %v241_v52  ;;  %v1377_v0 = vpack.c.bf16 %v274_v55, %v273_v54  ;;  %v231_v35 = vld [vmem:[%s2255_s1 + $0x640] sm:$0xff]  ;;  %v264_v39 = vld [vmem:[%s2255_s1 + $0x748] sm:$0xff]  ;;  %v250_v41 = vld [vmem:[%s2255_s1 + $0x6d8] sm:$0xff] }
  0x52   :  { %1294 = vmatprep.subr.bf16.mxu0 %v1293_v62  ;;  %v226_v62 = vld [vmem:[%s2255_s1 + $0x618] sm:$0xff]  ;;  %v263_v37 = vld [vmem:[%s2255_s1 + $0x740] sm:$0xff]  ;;  %v281_v42 = vld [vmem:[%s2255_s1 + $0x7d0] sm:$0xff] }
  0x53   :  { %1324 = vmatpush3.bf16.msra.mxu1 %v1323_v61  ;;  %v225_v61 = vld [vmem:[%s2255_s1 + $0x610] sm:$0xff]  ;;  %v282_v43 = vld [vmem:[%s2255_s1 + $0x7d8] sm:$0xff]  ;;  %v251_v52 = vld [vmem:[%s2255_s1 + $0x6e0] sm:$0xff] }
  0x54   :  { %1326 = vmatprep.subr.bf16.mxu1 %v1325_v2  ;;  %v243_v2 = vld [vmem:[%s2255_s1 + $0x6a0] sm:$0xff]  ;;  %v1347_v7 = vpack.c.bf16 %v226_v62, %v225_v61  ;;  %v233_v47 = vld [vmem:[%s2255_s1 + $0x650] sm:$0xff]  ;;  %v234_v48 = vld [vmem:[%s2255_s1 + $0x658] sm:$0xff] }
  0x55   :  { %1296 = vmatpush3.bf16.msra.mxu0 %v1295_v8  ;;  %v30_v8 = vld [vmem:[%s2256_s0 + $0x78] sm:$0xff]  ;;  %v265_v49 = vld [vmem:[%s2255_s1 + $0x750] sm:$0xff]  ;;  %v252_v53 = vld [vmem:[%s2255_s1 + $0x6e8] sm:$0xff] }
  0x56   :  { %1298 = vmatprep.subr.bf16.mxu0 %v1297_v10  ;;  %v1349_v10 = vpack.c.bf16 %v244_v3, %v243_v2  ;;  %v266_v51 = vld [vmem:[%s2255_s1 + $0x758] sm:$0xff]  ;;  %v283_v54 = vld [vmem:[%s2255_s1 + $0x7e0] sm:$0xff]  ;;  %v284_v55 = vld [vmem:[%s2255_s1 + $0x7e8] sm:$0xff] }
  0x57   :  { %1328 = vmatpush3.bf16.msra.mxu1 %v1327_v9  ;;  %v1379_v9 = vpack.c.bf16 %v258_v1, %v257_v63  ;;  %v267_v61 = vld [vmem:[%s2255_s1 + $0x760] sm:$0xff]  ;;  %v1397_v62 = vpack.c.bf16 %v284_v55, %v283_v54  ;;  %v268_v63 = vld [vmem:[%s2255_s1 + $0x768] sm:$0xff]  ;;  %v254_v1 = vld [vmem:[%s2255_s1 + $0x6f8] sm:$0xff] }
  0x58   :  { %1330 = vmatprep.subr.bf16.mxu1 %v1329_v14  ;;  %v1381_v14 = vpack.c.bf16 %v276_v5, %v275_v4  ;;  %v285_v2 = vld [vmem:[%s2255_s1 + $0x7f0] sm:$0xff]  ;;  %v286_v3 = vld [vmem:[%s2255_s1 + $0x7f8] sm:$0xff]  ;;  %v1399_v5 = vpack.c.bf16 %v268_v63, %v267_v61 }
  0x59   :  { %1300 = vmatpush3.bf16.msra.mxu0 %v1299_v20  ;;  %v1351_v20 = vpack.c.bf16 %v228_v12, %v227_v11  ;;  %v270_v11 = vld [vmem:[%s2255_s1 + $0x778] sm:$0xff] }
  0x5a   :  { %1302 = vmatprep.subr.bf16.mxu0 %v1301_v22  ;;  %v1353_v22 = vpack.c.bf16 %v246_v17, %v245_v16  ;;  %v288_v17 = vstv %s2257_s2 }
  0x5b   :  { %1332 = vmatpush3.bf16.msra.mxu1 %v1331_v21  ;;  %v1383_v21 = vpack.c.bf16 %v260_v15, %v259_v13  ;;  %v29_v15 = vld [vmem:[%s2256_s0 + $0x70] sm:$0xff] }
  0x5c   :  { %1334 = vmatprep.subr.bf16.mxu1 %v1333_v26  ;;  %v1385_v26 = vpack.c.bf16 %v278_v19, %v277_v18 }
  0x5d   :  { %1304 = vmatpush3.bf16.msra.mxu0 %v1303_v32  ;;  %v1355_v32 = vpack.c.bf16 %v230_v24, %v229_v23 }
  0x5e   :  { %1306 = vmatprep.subr.bf16.mxu0 %v1305_v34  ;;  %v1357_v34 = vpack.c.bf16 %v248_v29, %v247_v28 }
  0x5f   :  { %1336 = vmatpush3.bf16.msra.mxu1 %v1335_v33  ;;  %v1387_v33 = vpack.c.bf16 %v262_v27, %v261_v25 }
  0x60   :  { %1338 = vmatprep.subr.bf16.mxu1 %v1337_v38  ;;  %v1389_v38 = vpack.c.bf16 %v280_v31, %v279_v30 }
  0x61   :  { %1308 = vmatpush3.bf16.msra.mxu0 %v1307_v44  ;;  %v1359_v44 = vpack.c.bf16 %v232_v36, %v231_v35 }
  0x62   :  { %1342 = vmatprep.subr.bf16.mxu0 %v1341_v46  ;;  %v1361_v46 = vpack.c.bf16 %v250_v41, %v249_v40 }
  0x63   :  { %1340 = vmatpush3.bf16.msra.mxu1 %v1339_v45  ;;  %v1391_v45 = vpack.c.bf16 %v264_v39, %v263_v37 }
  0x64   :  { %1374 = vmatprep.subr.bf16.mxu1 %v1373_v50  ;;  %634 = vmatmul.mubr.f32.vlgmr.msra.gmra.mrb[4].mxu0 %v23_v56  ;;  %v1393_v50 = vpack.c.bf16 %v282_v43, %v281_v42  ;;  %v1363_v56 = vpack.c.bf16 %v234_v48, %v233_v47 }
  0x65   :  { %1344 = vmatpush3.bf16.msra.mxu0 %v1343_v57  ;;  %773 = vmatprep.mubr.f32.mxu0 %v28_v6  ;;  %v1395_v57 = vpack.c.bf16 %v266_v51, %v265_v49 }
  0x66   :  { %704 = vmatmul.mubr.f32.vlgmr.msra.gmra.mrb[4].mxu1 %v25_v58  ;;  %1346 = vmatprep.subr.bf16.mxu0 %v1345_v60  ;;  %v1365_v58 = vpack.c.bf16 %v252_v53, %v251_v52  ;;  %v236_v60 = vld [vmem:[%s2255_s1 + $0x668] sm:$0xff] }
  0x67   :  { %1376 = vmatpush3.bf16.msra.mxu1 %v1375_v59  ;;  %843 = vmatprep.mubr.f32.mxu1 %v30_v8  ;;  %v235_v59 = vld [vmem:[%s2255_s1 + $0x660] sm:$0xff]  ;;  %v238_v8 = vld [vmem:[%s2255_s1 + $0x678] sm:$0xff] }
  0x68   :  { %1378 = vmatprep.subr.bf16.mxu1 %v1377_v0  ;;  %v253_v0 = vld [vmem:[%s2255_s1 + $0x6f0] sm:$0xff]  ;;  %v1367_v4 = vpack.c.bf16 %v236_v60, %v235_v59 }
  0x69   :  { %1348 = vmatpush3.bf16.msra.mxu0 %v1347_v7  ;;  %v1369_v6 = vpack.c.bf16 %v254_v1, %v253_v0  ;;  %v237_v7 = vld [vmem:[%s2255_s1 + $0x670] sm:$0xff] }
  0x6a   :  { %1350 = vmatprep.subr.bf16.mxu0 %v1349_v10  ;;  %v269_v10 = vld [vmem:[%s2255_s1 + $0x770] sm:$0xff]  ;;  %v1371_v12 = vpack.c.bf16 %v238_v8, %v237_v7 }
  0x6b   :  { %1380 = vmatpush3.bf16.msra.mxu1 %v1379_v9  ;;  %v1401_v9 = vpack.c.bf16 %v286_v3, %v285_v2  ;;  %v1403_v13 = vpack.c.bf16 %v270_v11, %v269_v10 }
  0x6c   :  { %1382 = vmatprep.subr.bf16.mxu1 %v1381_v14  ;;  %v27_v14 = vld [vmem:[%s2256_s0 + $0x60] sm:$0xff] }
  0x6d   :  { %1352 = vmatpush3.bf16.msra.mxu0 %v1351_v20 }
  0x6e   :  { %1354 = vmatprep.subr.bf16.mxu0 %v1353_v22 }
  0x6f   :  { %1384 = vmatpush3.bf16.msra.mxu1 %v1383_v21 }
  0x70   :  { %1386 = vmatprep.subr.bf16.mxu1 %v1385_v26 }
  0x71   :  { %1356 = vmatpush3.bf16.msra.mxu0 %v1355_v32 }
  0x72   :  { %1358 = vmatprep.subr.bf16.mxu0 %v1357_v34 }
  0x73   :  { %1388 = vmatpush3.bf16.msra.mxu1 %v1387_v33 }
  0x74   :  { %1390 = vmatprep.subr.bf16.mxu1 %v1389_v38 }
  0x75   :  { %1360 = vmatpush3.bf16.msra.mxu0 %v1359_v44 }
  0x76   :  { %1362 = vmatprep.subr.bf16.mxu0 %v1361_v46 }
  0x77   :  { %1392 = vmatpush3.bf16.msra.mxu1 %v1391_v45 }
  0x78   :  { %1394 = vmatprep.subr.bf16.mxu1 %v1393_v50 }
  0x79   :  { %1364 = vmatpush3.bf16.msra.mxu0 %v1363_v56 }
  0x7a   :  { %1366 = vmatprep.subr.bf16.mxu0 %v1365_v58 }
  0x7b   :  { %1396 = vmatpush3.bf16.msra.mxu1 %v1395_v57 }
  0x7c   :  { %1398 = vmatprep.subr.bf16.mxu1 %v1397_v62 }
  0x7d   :  { %1368 = vmatpush3.bf16.msra.mxu0 %v1367_v4 }
  0x7e   :  { %1370 = vmatprep.subr.bf16.mxu0 %v1369_v6 }
  0x7f   :  { %1400 = vmatpush3.bf16.msra.mxu1 %v1399_v5 }
  0x80   :  { %1402 = vmatprep.subr.bf16.mxu1 %v1401_v9 }
  0x81   :  { %1372 = vmatpush3.bf16.msra.mxu0 %v1371_v12 }
  0x83   :  { %1404 = vmatpush3.bf16.msra.mxu1 %v1403_v13 }
  0x84   :  { %774 = vmatmul.mubr.f32.vlgmr.msra.gmra.mrb[6].mxu0 %v27_v14 }
  0x86   :  { %844 = vmatmul.mubr.f32.vlgmr.msra.gmra.mrb[6].mxu1 %v29_v15 }
  0xf7   :  { %v901_v16 = vpop.f32.mrb[0].mxu0 }
  0xf8   :  { %v902_v18 = vpop.f32.mrb[1].mxu0 }
  0xf9   :  { %v936_v19 = vpop.f32.mrb[0].mxu1  ;;  %v903_v20 = vadd.f32 %v902_v18, %v901_v16 }
  0xfa   :  { %v937_v21 = vpop.f32.mrb[1].mxu1 }
  0xfb   :  { %v938_v22 = vadd.f32 %v937_v21, %v936_v19  ;;  %v356_v23 = vadd.f32 %v903_v20, %v288_v17 }
  0xfd   :  { %v426_v24 = vadd.f32 %v938_v22, %v356_v23 }
 0x117   :  { %v971_v25 = vpop.f32.mrb[2].mxu0 }
 0x118   :  { %v972_v26 = vpop.f32.mrb[3].mxu0 }
 0x119   :  { %v1006_v27 = vpop.f32.mrb[2].mxu1  ;;  %v973_v28 = vadd.f32 %v972_v26, %v971_v25 }
 0x11a   :  { %v1007_v29 = vpop.f32.mrb[3].mxu1 }
 0x11b   :  { %v1008_v30 = vadd.f32 %v1007_v29, %v1006_v27  ;;  %v496_v31 = vadd.f32 %v973_v28, %v426_v24 }
 0x11d   :  { %v566_v32 = vadd.f32 %v1008_v30, %v496_v31 }
 0x137   :  { %v1041_v33 = vpop.f32.mrb[4].mxu0 }
 0x138   :  { %v1042_v34 = vpop.f32.mrb[5].mxu0 }
 0x139   :  { %v1076_v35 = vpop.f32.mrb[4].mxu1  ;;  %v1043_v36 = vadd.f32 %v1042_v34, %v1041_v33 }
 0x13a   :  { %v1077_v37 = vpop.f32.mrb[5].mxu1 }
 0x13b   :  { %v1078_v38 = vadd.f32 %v1077_v37, %v1076_v35  ;;  %v636_v39 = vadd.f32 %v1043_v36, %v566_v32 }
 0x13d   :  { %v706_v40 = vadd.f32 %v1078_v38, %v636_v39 }
 0x157   :  { %v1111_v41 = vpop.f32.mrb[6].mxu0 }
 0x158   :  { %v1112_v42 = vpop.f32.mrb[7].mxu0 }
 0x159   :  { %v1146_v43 = vpop.f32.mrb[6].mxu1  ;;  %v1113_v44 = vadd.f32 %v1112_v42, %v1111_v41 }
 0x15a   :  { %v1147_v45 = vpop.f32.mrb[7].mxu1 }
 0x15b   :  { %v1148_v46 = vadd.f32 %v1147_v45, %v1146_v43  ;;  %v776_v47 = vadd.f32 %v1113_v44, %v706_v40 }
 0x15d   :  { %v846_v48 = vadd.f32 %v1148_v46, %v776_v47 }
 0x15f   :  { %v849_v49 = vsub.f32 0.0, %v846_v48 }
 0x161   :  { %v850_v50 = vmul.f32 1.442695, %v849_v49 }
 0x163   :  { %1405 = vpow2.f32 %v850_v50 }
 0x16d   :  { %v1406_v51 = vpop.eup %1405 }
 0x16e   :  { %v852_v52 = vadd.f32 1.0, %v1406_v51 }
 0x170   :  { %1407 = vrcp.f32 %v852_v52 }
 0x17a   :  { %v1408_v53 = vpop.eup %1407 }
 0x17b   :  { %v855_v54 = vsel %vm854_vm0, %v1408_v53, 0.0  ;;  %v858_v55 = vmul.f32 2.0, %v1408_v53 }
 0x17c   :  { %856 = vadd.xlane.f32.xlu0 %v855_v54 }
 0x209   :  { %v857_v56 = vpop.xlane.xlu0 %856 }
 0x20a   :  { %v859_v57 = vsub.f32 %v857_v56, %v858_v55 }
 0x20c   :  { %v860_v58 = vmul.f32 1.442695, %v859_v57 }
 0x20e   :  { %1409 = vpow2.f32 %v860_v58 }
 0x218   :  { %v1410_v59 = vpop.eup %1409 }
 0x219   :  { %v862_v60 = vadd.f32 1.0, %v1410_v59 }
 0x21b   :  { %1411 = vrcp.f32 %v862_v60 }
 0x225   :  { %v1412_v61 = vpop.eup %1411 }
 0x226   :  { %864 = vst.msk [vmem:[%s2258_s3] sm:$0xff] %vm854_vm0, %v1412_v61 }

</bundles_post_ra>
